<compile_context>
chip_gen: v7x
topology: tpu7x:2x2x1
jax: 0.10.0
libtpu: 0.0.40
codegen_flags: <defaults>
</compile_context>

<pallas_src>
import jax
import jax.numpy as jnp
from jax.experimental import pallas as pl
from jax.experimental.pallas import tpu as pltpu


def _element_scale_kernel(x_ref, scale_ref, o_ref):
    # x_ref: (TR, TL), scale_ref: (TR, 1) fp32, o_ref: (TR, TL).
    # Multiply in fp32 (matches fp32 scale parameter precision), cast on store.
    x = x_ref[...].astype(jnp.float32)
    o_ref[...] = (x * scale_ref[...]).astype(o_ref.dtype)


# ~4 MiB x tile -> ~16 MiB total (x + out double-buffered); fits the 32 MiB
# scoped-VMEM limit we request below on every generation (v5e/v6e/v7x).
_TARGET_TILE_BYTES = 4 * 1024 * 1024
_VMEM_LIMIT_BYTES = 32 * 1024 * 1024


def _round_down(x: int, m: int) -> int:
    return (x // m) * m


def _round_up(x: int, m: int) -> int:
    return ((x + m - 1) // m) * m


def _row_align(dtype) -> int:
    """Sublane alignment matched to packed-vreg row counts for the dtype."""
    itemsize = jnp.dtype(dtype).itemsize
    if itemsize >= 4:
        return 8
    if itemsize == 2:
        return 16
    return 32


def _pick_tiles(num_rows: int, num_lanes: int, itemsize: int, row_align: int):
    """Pick (row_tile, lane_tile); ragged (cdiv) last blocks are allowed."""
    # ---- lane tile ----
    # Prefer full rows: one contiguous HBM DMA per tile, fewest grid steps.
    if row_align * num_lanes * itemsize <= _TARGET_TILE_BYTES:
        lane_tile = num_lanes
    else:
        # Must split L.  Budget-limited, 128-aligned lane tile.
        limit = max(128, _round_down(_TARGET_TILE_BYTES // (row_align * itemsize), 128))
        limit = min(limit, max(128, _round_down(num_lanes, 128)))
        lane_tile = 0
        cand = limit
        while cand >= 128:                      # prefer an exact divisor of L
            if num_lanes % cand == 0:
                lane_tile = cand
                break
            cand -= 128
        if lane_tile == 0:
            lane_tile = limit                   # fixed tile + ragged last block

    # ---- row tile ----
    if num_rows <= row_align:
        return num_rows, lane_tile              # full-extent row block

    budget_rows = max(
        row_align,
        _round_down(_TARGET_TILE_BYTES // (lane_tile * itemsize), row_align),
    )
    # Cap so the row ("parallel") axis has >= 2 blocks whenever possible, so
    # the grid shards across both TensorCores on v7x.
    half_cap = _round_up((num_rows + 1) // 2, row_align)
    row_cap = half_cap if half_cap < num_rows else num_rows
    row_tile = min(budget_rows, row_cap)
    return row_tile, lane_tile


def element_scale(x: jax.Array, scale: jax.Array, *, donate_x: bool = False) -> jax.Array:
    """Computes x * scale with scale of shape (1, C, 1), x of shape (B, C, L)."""
    B, C, L = x.shape
    assert scale.shape == (1, C, 1), scale.shape

    R = B * C
    itemsize = jnp.dtype(x.dtype).itemsize
    row_align = _row_align(x.dtype)
    tr, tl = _pick_tiles(R, L, itemsize, row_align)
    grid = (pl.cdiv(R, tr), pl.cdiv(L, tl))

    # Flat 2-D views: x -> (B*C, L); scale -> per-row (B*C, 1) fp32 vector.
    x2 = x.reshape(R, L)
    scale_rows = jnp.broadcast_to(
        scale.reshape(1, C, 1).astype(jnp.float32), (B, C, 1)
    ).reshape(R, 1)

    out2 = pl.pallas_call(
        _element_scale_kernel,
        out_shape=jax.ShapeDtypeStruct((R, L), x.dtype),
        grid_spec=pltpu.PrefetchScalarGridSpec(
            num_scalar_prefetch=0,
            grid=grid,
            in_specs=[
                # L innermost -> scale block index constant across inner steps.
                pl.BlockSpec((tr, tl), lambda r, l: (r, l)),
                pl.BlockSpec((tr, 1), lambda r, l: (r, 0)),
            ],
            out_specs=pl.BlockSpec((tr, tl), lambda r, l: (r, l)),
        ),
        compiler_params=pltpu.CompilerParams(
            dimension_semantics=("parallel", "parallel"),
            vmem_limit_bytes=_VMEM_LIMIT_BYTES,
        ),
        cost_estimate=pl.CostEstimate(
            flops=R * L,
            transcendentals=0,
            bytes_accessed=2 * R * L * itemsize + R * 4,
        ),
        # Alias x2 -> out2 only when the caller can donate x (HBM output
        # allocation removed; safe because the x/out index maps are identical).
        input_output_aliases=({0: 0} if donate_x else {}),
    )(x2, scale_rows)
    return out2.reshape(B, C, L)


class ElementScaleJax:
    """JAX mirror of the PyTorch ElementScale module."""

    def __init__(self, embed_dims: int, init_value: float = 0.0):
        # Deterministic init, same as PyTorch: init_value * ones((1, C, 1)).
        self.scale = init_value * jnp.ones((1, embed_dims, 1), dtype=jnp.float32)

    def __call__(self, x: jax.Array) -> jax.Array:
        return element_scale(x, self.scale)


if __name__ == "__main__":
    key = jax.random.PRNGKey(0)

    # 1) Small fp32 case consistent with the module: (batch, embed_dims, seq).
    B, C, L = 2, 4, 16
    x = jax.random.normal(key, (B, C, L), dtype=jnp.float32)
    mod = ElementScaleJax(embed_dims=C, init_value=0.5)
    out = jax.block_until_ready(mod(x))
    ref = x * mod.scale
    assert out.shape == x.shape and out.dtype == x.dtype
    assert jnp.allclose(out, ref, atol=1e-6, rtol=1e-6)

    # 2) bf16 case (dtype-aware row alignment + fp32 in-kernel multiply),
    #    row axis split into 2 blocks (megacore path).
    B2, C2, L2 = 2, 16, 128
    x2 = jax.random.normal(jax.random.PRNGKey(1), (B2, C2, L2)).astype(jnp.bfloat16)
    mod2 = ElementScaleJax(embed_dims=C2, init_value=1.25)
    out2 = jax.block_until_ready(mod2(x2))
    ref2 = (x2.astype(jnp.float32) * mod2.scale).astype(jnp.bfloat16)
    assert out2.dtype == jnp.bfloat16
    assert jnp.allclose(out2.astype(jnp.float32), ref2.astype(jnp.float32),
                        atol=1e-6, rtol=1e-6)

    # 3) Ragged row tiling (R = 20 -> row_tile 16 + partial last block).
    B3, C3, L3 = 2, 10, 48
    x3 = jax.random.normal(jax.random.PRNGKey(2), (B3, C3, L3), dtype=jnp.float32)
    mod3 = ElementScaleJax(embed_dims=C3, init_value=-0.75)
    out3 = jax.block_until_ready(mod3(x3))
    ref3 = x3 * mod3.scale
    assert jnp.allclose(out3, ref3, atol=1e-6, rtol=1e-6)

    print("KERNEL_OK")
</pallas_src>

<mosaic_0001>
module attributes {stable_mosaic.version = 11 : i64} {
  func.func @_element_scale_kernel(%arg0: i32, %arg1: i32, %arg2: memref<8x16xf32, #tpu.memory_space<vmem>>, %arg3: memref<8x1xf32, #tpu.memory_space<vmem>>, %arg4: memref<8x16xf32, #tpu.memory_space<vmem>>) attributes {dimension_semantics = [#tpu.dimension_semantics<parallel>, #tpu.dimension_semantics<parallel>], iteration_bounds = array<i64: 1, 1>, scalar_prefetch = 0 : i64, scratch_operands = 0 : i64, tpu.core_type = #tpu.core_type<tc>, window_params = [{transform_indices = @transform_0, window_bounds = array<i64: 8, 16>}, {transform_indices = @transform_1, window_bounds = array<i64: 8, 1>}, {transform_indices = @transform_2, window_bounds = array<i64: 8, 16>}]} {
    %c0 = arith.constant 0 : index
    %c0_0 = arith.constant 0 : index
    %0 = vector.load %arg2[%c0, %c0_0] : memref<8x16xf32, #tpu.memory_space<vmem>>, vector<8x16xf32>
    %c0_1 = arith.constant 0 : index
    %c0_2 = arith.constant 0 : index
    %1 = vector.load %arg3[%c0_1, %c0_2] : memref<8x1xf32, #tpu.memory_space<vmem>>, vector<8x1xf32>
    %2 = vector.broadcast %1 : vector<8x1xf32> to vector<8x16xf32>
    %3 = arith.mulf %0, %2 : vector<8x16xf32>
    %c0_3 = arith.constant 0 : index
    %c0_4 = arith.constant 0 : index
    %4 = vector.load %arg4[%c0_3, %c0_4] : memref<8x16xf32, #tpu.memory_space<vmem>>, vector<8x16xf32>
    tpu.vector_store %arg4[%c0_3, %c0_4], %3 {strides = array<i32>} : memref<8x16xf32, #tpu.memory_space<vmem>>, vector<8x16xf32>,
    return
  }
  func.func @transform_0(%arg0: i32, %arg1: i32) -> (i32, i32) {
    %c0_i32 = arith.constant 0 : i32
    return %arg0, %arg1 : i32, i32
  }
  func.func @transform_1(%arg0: i32, %arg1: i32) -> (i32, i32) {
    %c0_i32 = arith.constant 0 : i32
    %c0_i32_0 = arith.constant 0 : i32
    return %arg0, %c0_i32 : i32, i32
  }
  func.func @transform_2(%arg0: i32, %arg1: i32) -> (i32, i32) {
    %c0_i32 = arith.constant 0 : i32
    return %arg0, %arg1 : i32, i32
  }
}

</mosaic_0001>

<bundles_post_ra>
// kernel: tpu_custom_call.1
= control target key start
LH: loop header
LB: loop body
LE: loop exit
PB: predicated region body
PF: predicated region fallthrough
CT: control target
= control target key end

     0   :  { %s98_s0 = inlined_call_operand.vmem [shape: f32[8,16], index: 0, kind: input, shape index: {}]   ;;  %s99_s1 = inlined_call_operand.vmem [shape: f32[8,1], index: 1, kind: input, shape index: {}]   ;;  %s100_s2 = inlined_call_operand.hbm [shape: f32[8,16], index: 2, kind: output, shape index: {}]  }
   0x1   :  { %v13_v0 = vld [vmem:[%s99_s1] sm:$0xff] }
   0x2   :  { %7 = vsyncpa [#allocation3], 0  ;;  %v63_v1 = vmov 0   ;;  %v12_v2 = vld [vmem:[%s98_s0] sm:$0xff]  ;;  %s64_s13 = smov [#allocation2]   ;;  %vm20_vm0 = vcmask 130048  }
   0x3   :  { %38 = vset.pattern.permute.xlu0 %v63_v1  ;;  %s28_s14 = sshll.u32 %s64_s13, 4  ;;  %s29_s14 = int_to_ptr.vmem [resolvable:$true] %s28_s14 }
   0x4   :  { %16 = vperm.xlu0 %38, %v13_v0   ;;  %s39_s15 = scalar_lea.vmem %s29_s14, 128  ;;  %p44_p1 = scmp.lt.s32.totalorder %s29_s14, %s29_s14 }
   0x5   :  { %p40_p0 = scmp.ne.s32.totalorder %s29_s14, %s39_s15  ;;  %p45_p2 = scmp.lt.s32.totalorder %s39_s15, %s39_s15 }
   0x7   :  { %p46_p3 = por %p45_p2, %p44_p1 }
   0x9   :  { %p47_p4 = pnand %p46_p3, %p40_p0 }
  0x83   :  { %v17_v3 = vpop.permute.xlu0 %16 }
  0x84   :  { %v19_v4 = vmul.f32 %v17_v3, %v12_v2 }
  0x86   :  { %21 = vst.msk [vmem:[#allocation2] sm:$0xff] %vm20_vm0, %v19_v4 }
  0x87   :  { %50 = shalt.err (!%p47_p4)
}
  0x88   :  { %s51_s17 = scalar_lea.hbm %s100_s2, 128 }
  0x89   :  { %p52_p5 = scmp.ne.s32.totalorder %s100_s2, %s51_s17  ;;  %p55_p6 = scmp.lt.u32.totalorder %s51_s17, %s100_s2 }
  0x8b   :  { %p57_p7 = pnand %p55_p6, %p52_p5 }
  0x8d   :  { %60 = shalt.err (!%p57_p7)
}
  0x8e   :  { %31 = dma.vmem_to_hbm [thread:$0]  %s29_s14, 128, %s100_s2, [#allocation3]  }
  0x8f   :  { %61 = dma.done.wait [#allocation3], 128  }
  0x90   :  { %62 = vsyncadd [#allocation3], 4294967168 }
  0x91   :  { %35 = vsyncpa [#allocation3], 1 }

</bundles_post_ra>
